<compile_context>
chip_gen: v5e
topology: v5e:2x2
jax: 0.10.0
libtpu: 0.0.40
codegen_flags: <defaults>
</compile_context>

<pallas_src>
from functools import partial
from math import sqrt

import jax
import jax.numpy as jnp
from jax.experimental import pallas as pl
from jax.experimental.pallas import tpu as pltpu

_MIB = 1024 * 1024
_VMEM_BUDGET = 40 * _MIB              # working-set target (safe on v7x's 64 MiB VMEM)
_VMEM_HEADROOM = 8 * _MIB
_MAX_RESIDENT_WEIGHT_BYTES = 24 * _MIB  # above this, tile over the hidden dim


def _round_up(v, m):
    return ((v + m - 1) // m) * m


def _const_spec(shape, index_map):
    """BlockSpec for a grid-invariant operand: request a single VMEM buffer."""
    try:
        return pl.BlockSpec(shape, index_map, pipeline_mode=pl.Buffered(1))
    except (TypeError, AttributeError):   # older API without pipeline_mode
        return pl.BlockSpec(shape, index_map)


# --------------------------------------------------------------------------- kernels
def _fc_res_block_kernel(x_ref, w1_ref, b1_ref, w2_ref, b2_ref, o_ref):
    # x tile: (TB, D_pad).  MXU inputs bf16; accumulation + epilogue in f32.
    a = jnp.maximum(x_ref[...].astype(jnp.bfloat16), 0)            # ReLU(x) (bf16)
    h = jnp.dot(a, w1_ref[...], preferred_element_type=jnp.float32)
    h = jnp.maximum(h + b1_ref[...], 0.0)                          # bias + ReLU (f32)
    y = jnp.dot(h.astype(jnp.bfloat16), w2_ref[...],
                preferred_element_type=jnp.float32)
    x_f32 = x_ref[...].astype(jnp.float32)                         # exact residual path
    o_ref[...] = (x_f32 + y + b2_ref[...]).astype(o_ref.dtype)


def _fc_res_block_kernel_htiled(x_ref, w1_ref, b1_ref, w2_ref, b2_ref, o_ref, acc_ref):
    # Grid = (batch tiles, hidden tiles); the hidden ("arbitrary") axis is the reduction.
    k = pl.program_id(1)

    @pl.when(k == 0)
    def _():
        acc_ref[...] = jnp.zeros_like(acc_ref)

    a = jnp.maximum(x_ref[...].astype(jnp.bfloat16), 0)
    h = jnp.dot(a, w1_ref[...], preferred_element_type=jnp.float32)
    h = jnp.maximum(h + b1_ref[...], 0.0)
    acc_ref[...] += jnp.dot(h.astype(jnp.bfloat16), w2_ref[...],
                            preferred_element_type=jnp.float32)

    @pl.when(k == pl.num_programs(1) - 1)
    def _():
        x_f32 = x_ref[...].astype(jnp.float32)
        o_ref[...] = (x_f32 + acc_ref[...] + b2_ref[...]).astype(o_ref.dtype)


# --------------------------------------------------------------------------- wrapper
def prepare_fc_res_block_params(params):
    """Pad feature dims to multiples of 128 and cast weights to bf16 ONCE.

    Store the result as the canonical params to avoid a per-call pad/cast HBM pass."""
    w1, b1, w2, b2 = params
    d, h = w1.shape
    assert w2.shape == (h, d)
    d_pad, h_pad = _round_up(d, 128), _round_up(h, 128)
    w1p = jnp.pad(w1, ((0, d_pad - d), (0, h_pad - h))).astype(jnp.bfloat16)
    w2p = jnp.pad(w2, ((0, h_pad - h), (0, d_pad - d))).astype(jnp.bfloat16)
    b1p = jnp.pad(b1.astype(jnp.float32), (0, h_pad - h)).reshape(1, h_pad)
    b2p = jnp.pad(b2.astype(jnp.float32), (0, d_pad - d)).reshape(1, d_pad)
    return (w1p, b1p, w2p, b2p)


def fc_res_block_forward(x, params, *, batch_tile=512, h_tile=512,
                         max_resident_weight_bytes=_MAX_RESIDENT_WEIGHT_BYTES,
                         out_dtype=None):
    """Pallas forward of FCResBlock: x + Linear2(ReLU(Linear1(ReLU(x)))).

    x: (..., res_dim).  params is either the raw tuple (w1, b1, w2, b2) with w1:(D,H),
    w2:(H,D) (transposed vs. PyTorch nn.Linear.weight), or the output of
    prepare_fc_res_block_params (padded bf16 weights; preferred — no per-call pad/cast).
    Pass bf16 x / out_dtype=bf16 to halve HBM traffic if the surrounding model allows.
    """
    w1, b1, w2, b2 = params
    d = x.shape[-1]
    prepared = (w1.dtype == jnp.bfloat16 and b1.ndim == 2)
    if prepared:
        w1p, b1p, w2p, b2p = w1, b1, w2, b2
    else:
        assert w1.shape[0] == d
        w1p, b1p, w2p, b2p = prepare_fc_res_block_params(params)
    d_pad, h_pad = w1p.shape
    assert w2p.shape == (h_pad, d_pad) and d <= d_pad

    out_dtype = x.dtype if out_dtype is None else out_dtype
    orig_shape = x.shape
    x2d = x.reshape(-1, d)
    b = x2d.shape[0]
    if b == 0:                          # empty batch: shape-preserving no-op
        return x.astype(out_dtype)

    x_isize = x2d.dtype.itemsize
    o_isize = jnp.dtype(out_dtype).itemsize

    # --- batch tile: big tiles amortize per-step overhead; keep >= 2 grid steps for
    # any b >= 16 so v7x's two TensorCores both get work on the "parallel" axis.
    batch_tile = max(8, _round_up(batch_tile, 8))
    if b >= 16:
        tb = min(batch_tile, _round_up(-(-b // 2), 8))
    else:
        tb = _round_up(b, 8)

    # --- resident-weights vs hidden-tiled path, sized against VMEM.
    weight_bytes = (w1p.size * w1p.dtype.itemsize + w2p.size * w2p.dtype.itemsize
                    + b1p.size * 4 + b2p.size * 4)
    use_h_tiling = weight_bytes > max_resident_weight_bytes
    if use_h_tiling:
        th = min(h_pad, max(128, (h_tile // 128) * 128))
        while h_pad % th:
            th -= 128
    else:
        th = h_pad

    def vmem_need(tb_):
        act = 2 * tb_ * d_pad * (x_isize + o_isize)                # double-buffered in/out
        if use_h_tiling:
            wts = 2 * (2 * d_pad * th * 2 + th * 4) + d_pad * 4     # dbl-buffered W/b1 tiles
            return act + tb_ * d_pad * 4 + wts                      # + f32 accumulator
        return act + weight_bytes                                   # single-buffered weights

    while tb > 8 and vmem_need(tb) > _VMEM_BUDGET:
        tb = max(8, _round_up(tb // 2, 8))

    b_pad = _round_up(b, tb)
    needs_pad = (b_pad != b) or (d_pad != d)
    if needs_pad:
        x2d = jnp.pad(x2d, ((0, b_pad - b), (0, d_pad - d)))

    # Request only what we need (+headroom); never the whole v7x VMEM.
    vmem_limit = int(min(max(vmem_need(tb) + _VMEM_HEADROOM, 32 * _MIB), 48 * _MIB))
    nb = b_pad // tb

    if not use_h_tiling:
        out = pl.pallas_call(
            _fc_res_block_kernel,
            out_shape=jax.ShapeDtypeStruct((b_pad, d_pad), out_dtype),
            grid_spec=pltpu.PrefetchScalarGridSpec(
                num_scalar_prefetch=0,
                grid=(nb,),
                in_specs=[
                    pl.BlockSpec((tb, d_pad), lambda i: (i, 0)),      # x tile (streamed)
                    _const_spec((d_pad, h_pad), lambda i: (0, 0)),    # resident weights
                    _const_spec((1, h_pad), lambda i: (0, 0)),
                    _const_spec((h_pad, d_pad), lambda i: (0, 0)),
                    _const_spec((1, d_pad), lambda i: (0, 0)),
                ],
                out_specs=pl.BlockSpec((tb, d_pad), lambda i: (i, 0)),
            ),
            compiler_params=pltpu.CompilerParams(
                dimension_semantics=("parallel",),
                vmem_limit_bytes=vmem_limit,
            ),
        )(x2d, w1p, b1p, w2p, b2p)
    else:
        nh = h_pad // th
        out = pl.pallas_call(
            _fc_res_block_kernel_htiled,
            out_shape=jax.ShapeDtypeStruct((b_pad, d_pad), out_dtype),
            grid_spec=pltpu.PrefetchScalarGridSpec(
                num_scalar_prefetch=0,
                grid=(nb, nh),
                in_specs=[
                    pl.BlockSpec((tb, d_pad), lambda i, k: (i, 0)),
                    pl.BlockSpec((d_pad, th), lambda i, k: (0, k)),
                    pl.BlockSpec((1, th), lambda i, k: (0, k)),
                    pl.BlockSpec((th, d_pad), lambda i, k: (k, 0)),
                    _const_spec((1, d_pad), lambda i, k: (0, 0)),
                ],
                out_specs=pl.BlockSpec((tb, d_pad), lambda i, k: (i, 0)),
                scratch_shapes=[pltpu.VMEM((tb, d_pad), jnp.float32)],
            ),
            compiler_params=pltpu.CompilerParams(
                dimension_semantics=("parallel", "arbitrary"),
                vmem_limit_bytes=vmem_limit,
            ),
        )(x2d, w1p, b1p, w2p, b2p)

    if needs_pad:
        out = out[:b, :d]
    return out.reshape(orig_shape)


# --------------------------------------------------------------------------- helpers
def init_fc_res_block_params(key, res_dim, n_res_hidden):
    """nn.Linear-style init: U(-1/sqrt(fan_in), 1/sqrt(fan_in)); weights (fan_in, fan_out)."""
    dims = [(res_dim, n_res_hidden), (n_res_hidden, res_dim)]
    params = []
    for fan_in, fan_out in dims:
        key, kw, kb = jax.random.split(key, 3)
        bound = 1.0 / sqrt(fan_in)
        w = jax.random.uniform(kw, (fan_in, fan_out), jnp.float32, -bound, bound)
        b = jax.random.uniform(kb, (fan_out,), jnp.float32, -bound, bound)
        params += [w, b]
    return tuple(params)


def fc_res_block_reference(x, params):
    """Pure-JAX (f32) reference of the PyTorch forward."""
    w1, b1, w2, b2 = params
    d = w1.shape[0]
    h = x.reshape(-1, d).astype(jnp.float32)
    a = jnp.maximum(h, 0.0)
    a = jnp.maximum(a @ w1 + b1, 0.0)
    out = h + a @ w2 + b2
    return out.reshape(x.shape)


if __name__ == "__main__":
    res_dim = 96        # exercises feature padding 96 -> 128
    n_res_hidden = 160  # exercises hidden padding 160 -> 256

    key = jax.random.PRNGKey(0)
    k_x1, k_x2, k_p = jax.random.split(key, 3)

    params = init_fc_res_block_params(k_p, res_dim, n_res_hidden)
    pparams = prepare_fc_res_block_params(params)   # pad + bf16 once, reused every call

    tol = dict(atol=2e-2, rtol=2e-2)   # bf16 MXU inputs with f32 accumulation

    # 1) small batch, prepared params, resident-weight path
    x1 = jax.random.normal(k_x1, (2, 3, res_dim), jnp.float32)
    y1 = jax.block_until_ready(jax.jit(fc_res_block_forward)(x1, pparams))
    assert y1.shape == x1.shape
    assert jnp.allclose(y1, fc_res_block_reference(x1, params), **tol)

    # 2) medium batch -> >= 2 "parallel" grid steps; raw (unpadded) params path
    x2 = jax.random.normal(k_x2, (300, res_dim), jnp.float32)
    y2 = jax.block_until_ready(jax.jit(fc_res_block_forward)(x2, params))
    assert jnp.allclose(y2, fc_res_block_reference(x2, params), **tol)

    # 3) hidden-tiled fallback path (forced), 2 reduction steps over the hidden dim
    fwd_ht = jax.jit(partial(fc_res_block_forward,
                             max_resident_weight_bytes=0, h_tile=128))
    y3 = jax.block_until_ready(fwd_ht(x2, pparams))
    assert jnp.allclose(y3, fc_res_block_reference(x2, params), **tol)

    print("KERNEL_OK")
</pallas_src>

<mosaic_0001>
module attributes {stable_mosaic.version = 11 : i64} {
  func.func @_fc_res_block_kernel(%arg0: i32, %arg1: memref<8x128xf32, #tpu.memory_space<vmem>>, %arg2: memref<128x256xbf16, #tpu.memory_space<vmem>>, %arg3: memref<1x256xf32, #tpu.memory_space<vmem>>, %arg4: memref<256x128xbf16, #tpu.memory_space<vmem>>, %arg5: memref<1x128xf32, #tpu.memory_space<vmem>>, %arg6: memref<8x128xf32, #tpu.memory_space<vmem>>) attributes {dimension_semantics = [#tpu.dimension_semantics<parallel>], iteration_bounds = array<i64: 1>, scalar_prefetch = 0 : i64, scratch_operands = 0 : i64, tpu.core_type = #tpu.core_type<tc>, window_params = [{transform_indices = @transform_0, window_bounds = array<i64: 8, 128>}, {pipeline_mode = #tpu.pipeline_mode<synchronous>, transform_indices = @transform_1, window_bounds = array<i64: 128, 256>}, {pipeline_mode = #tpu.pipeline_mode<synchronous>, transform_indices = @transform_2, window_bounds = array<i64: 1, 256>}, {pipeline_mode = #tpu.pipeline_mode<synchronous>, transform_indices = @transform_3, window_bounds = array<i64: 256, 128>}, {pipeline_mode = #tpu.pipeline_mode<synchronous>, transform_indices = @transform_4, window_bounds = array<i64: 1, 128>}, {transform_indices = @transform_5, window_bounds = array<i64: 8, 128>}]} {
    %c0 = arith.constant 0 : index
    %c0_0 = arith.constant 0 : index
    %0 = vector.load %arg1[%c0, %c0_0] : memref<8x128xf32, #tpu.memory_space<vmem>>, vector<8x128xf32>
    %1 = arith.truncf %0 : vector<8x128xf32> to vector<8x128xbf16>
    %cst = arith.constant 0.000000e+00 : bf16
    %2 = vector.broadcast %cst : bf16 to vector<8x128xbf16>
    %3 = arith.maximumf %1, %2 : vector<8x128xbf16>
    %c0_1 = arith.constant 0 : index
    %c0_2 = arith.constant 0 : index
    %4 = vector.load %arg2[%c0_1, %c0_2] : memref<128x256xbf16, #tpu.memory_space<vmem>>, vector<128x256xbf16>
    %cst_3 = arith.constant dense<0.000000e+00> : vector<8x256xf32>
    %5 = tpu.matmul %3, %4, %cst_3 {dimension_numbers = #tpu.dot_dimension_numbers<[1], [0], [0], [1], [0, 0, 1, 1], [], []>} : vector<8x128xbf16>, vector<128x256xbf16>, vector<8x256xf32> -> vector<8x256xf32>
    %c0_4 = arith.constant 0 : index
    %c0_5 = arith.constant 0 : index
    %6 = vector.load %arg3[%c0_4, %c0_5] : memref<1x256xf32, #tpu.memory_space<vmem>>, vector<1x256xf32>
    %7 = vector.broadcast %6 : vector<1x256xf32> to vector<8x256xf32>
    %8 = arith.addf %5, %7 : vector<8x256xf32>
    %cst_6 = arith.constant 0.000000e+00 : f32
    %9 = vector.broadcast %cst_6 : f32 to vector<8x256xf32>
    %10 = arith.maximumf %8, %9 : vector<8x256xf32>
    %11 = arith.truncf %10 : vector<8x256xf32> to vector<8x256xbf16>
    %c0_7 = arith.constant 0 : index
    %c0_8 = arith.constant 0 : index
    %12 = vector.load %arg4[%c0_7, %c0_8] : memref<256x128xbf16, #tpu.memory_space<vmem>>, vector<256x128xbf16>
    %cst_9 = arith.constant dense<0.000000e+00> : vector<8x128xf32>
    %13 = tpu.matmul %11, %12, %cst_9 {dimension_numbers = #tpu.dot_dimension_numbers<[1], [0], [0], [1], [0, 0, 1, 1], [], []>} : vector<8x256xbf16>, vector<256x128xbf16>, vector<8x128xf32> -> vector<8x128xf32>
    %c0_10 = arith.constant 0 : index
    %c0_11 = arith.constant 0 : index
    %14 = vector.load %arg1[%c0_10, %c0_11] : memref<8x128xf32, #tpu.memory_space<vmem>>, vector<8x128xf32>
    %15 = arith.addf %14, %13 : vector<8x128xf32>
    %c0_12 = arith.constant 0 : index
    %c0_13 = arith.constant 0 : index
    %16 = vector.load %arg5[%c0_12, %c0_13] : memref<1x128xf32, #tpu.memory_space<vmem>>, vector<1x128xf32>
    %17 = vector.broadcast %16 : vector<1x128xf32> to vector<8x128xf32>
    %18 = arith.addf %15, %17 : vector<8x128xf32>
    %c0_14 = arith.constant 0 : index
    %c0_15 = arith.constant 0 : index
    %19 = vector.load %arg6[%c0_14, %c0_15] : memref<8x128xf32, #tpu.memory_space<vmem>>, vector<8x128xf32>
    tpu.vector_store %arg6[%c0_14, %c0_15], %18 {strides = array<i32>} : memref<8x128xf32, #tpu.memory_space<vmem>>, vector<8x128xf32>,
    return
  }
  func.func @transform_0(%arg0: i32) -> (i32, i32) {
    %c0_i32 = arith.constant 0 : i32
    %c0_i32_0 = arith.constant 0 : i32
    return %arg0, %c0_i32 : i32, i32
  }
  func.func @transform_1(%arg0: i32) -> (i32, i32) {
    %c0_i32 = arith.constant 0 : i32
    %c0_i32_0 = arith.constant 0 : i32
    %c0_i32_1 = arith.constant 0 : i32
    return %c0_i32, %c0_i32_0 : i32, i32
  }
  func.func @transform_2(%arg0: i32) -> (i32, i32) {
    %c0_i32 = arith.constant 0 : i32
    %c0_i32_0 = arith.constant 0 : i32
    %c0_i32_1 = arith.constant 0 : i32
    return %c0_i32, %c0_i32_0 : i32, i32
  }
  func.func @transform_3(%arg0: i32) -> (i32, i32) {
    %c0_i32 = arith.constant 0 : i32
    %c0_i32_0 = arith.constant 0 : i32
    %c0_i32_1 = arith.constant 0 : i32
    return %c0_i32, %c0_i32_0 : i32, i32
  }
  func.func @transform_4(%arg0: i32) -> (i32, i32) {
    %c0_i32 = arith.constant 0 : i32
    %c0_i32_0 = arith.constant 0 : i32
    %c0_i32_1 = arith.constant 0 : i32
    return %c0_i32, %c0_i32_0 : i32, i32
  }
  func.func @transform_5(%arg0: i32) -> (i32, i32) {
    %c0_i32 = arith.constant 0 : i32
    %c0_i32_0 = arith.constant 0 : i32
    return %arg0, %c0_i32 : i32, i32
  }
}

</mosaic_0001>

<bundles_post_ra>
// kernel: fc_res_block_forward.1
= control target key start
LH: loop header
LB: loop body
LE: loop exit
PB: predicated region body
PF: predicated region fallthrough
CT: control target
= control target key end

     0   :  { %10 = vsyncpa [#allocation3], 0  ;;  %s629_s0 = inlined_call_operand.vmem [shape: f32[8,128], index: 0, kind: input, shape index: {}]   ;;  %s630_s1 = inlined_call_operand.hbm [shape: bf16[128,256], index: 1, kind: input, shape index: {}]   ;;  %s631_s2 = inlined_call_operand.vmem [shape: f32[1,256], index: 2, kind: input, shape index: {}]   ;;  %s632_s3 = inlined_call_operand.hbm [shape: bf16[256,128], index: 3, kind: input, shape index: {}]   ;;  %s633_s4 = inlined_call_operand.vmem [shape: f32[1,128], index: 4, kind: input, shape index: {}]   ;;  %s634_s5 = inlined_call_operand.vmem [shape: f32[8,128], index: 5, kind: output, shape index: {}]  }
   0x1   :  { %s18_s20 = sshll.u32 %s630_s1, 4  ;;  %s19_s20 = int_to_ptr.hbm [resolvable:$true] %s18_s20 }
   0x2   :  { %11 = vsyncpa [#allocation5], 0  ;;  %s575_s21 = smov [#allocation2]   ;;  %s33_s25 = sshll.u32 %s632_s3, 4  ;;  %s34_s25 = int_to_ptr.hbm [resolvable:$true] %s33_s25 }
   0x3   :  { %s20_s22 = sshll.u32 %s575_s21, 4  ;;  %s576_s26 = smov 128   ;;  %s21_s22 = int_to_ptr.vmem [resolvable:$true] %s20_s22 }
   0x4   :  { %s577_s27 = smov 8   ;;  %s578_s28 = smov [#allocation4]  }
   0x5   :  { %26 = dma.hbm_to_vmem [thread:$0]  %s19_s20, 2048, %s21_s22, [#allocation3], %s576_s26, %s576_s26, %s577_s27  }
   0x6   :  { %s35_s29 = sshll.u32 %s578_s28, 4  ;;  %s579_s30 = smov 64   ;;  %s36_s29 = int_to_ptr.vmem [resolvable:$true] %s35_s29 }
   0x7   :  { %s580_s6 = smov 4  }
   0x8   :  { %41 = dma.hbm_to_vmem [thread:$0]  %s34_s25, 2048, %s36_s29, [#allocation5], %s579_s30, %s579_s30, %s580_s6  }
   0x9   :  { %571 = dma.done.wait [#allocation3], 2048  }
   0xa   :  { %572 = vsyncadd [#allocation3], 4294965248 }
   0xb   :  { %573 = dma.done.wait [#allocation5], 2048  }
   0xc   :  { %574 = vsyncadd [#allocation5], 4294965248  ;;  %v414_v0 = vld [vmem:[#allocation2 + $0x70] sm:$0xf]  ;;  %v499_v1 = vld [vmem:[#allocation2 + $0x74] sm:$0xf0] }
   0xd   :  { %v498_v2 = vld [vmem:[#allocation2 + $0x74] sm:$0xf]  ;;  %v415_v3 = vor.u32 %v499_v1, %v414_v0  ;;  %v416_v4 = vld [vmem:[#allocation2 + $0x78] sm:$0xf0]  ;;  %v406_v5 = vld [vmem:[#allocation2 + $0x60] sm:$0xf] }
   0xe   :  { %v497_v6 = vld [vmem:[#allocation2 + $0x64] sm:$0xf0]  ;;  %v419_v7 = vor.u32 %v498_v2, %v416_v4  ;;  %v496_v8 = vld [vmem:[#allocation2 + $0x64] sm:$0xf]  ;;  %v408_v9 = vld [vmem:[#allocation2 + $0x68] sm:$0xf0] }
   0xf   :  { %159 = vmatpush.bf16.msra.mxu0 %v415_v3  ;;  %v407_v10 = vor.u32 %v497_v6, %v406_v5  ;;  %v411_v11 = vor.u32 %v496_v8, %v408_v9  ;;  %v398_v12 = vld [vmem:[#allocation2 + $0x50] sm:$0xf]  ;;  %v495_v13 = vld [vmem:[#allocation2 + $0x54] sm:$0xf0]  ;;  %v494_v14 = vld [vmem:[#allocation2 + $0x54] sm:$0xf] }
  0x10   :  { %172 = vmatpush.bf16.msra.mxu1 %v419_v7  ;;  %v400_v15 = vld [vmem:[#allocation2 + $0x58] sm:$0xf0]  ;;  %v399_v16 = vor.u32 %v495_v13, %v398_v12  ;;  %v390_v18 = vld [vmem:[#allocation2 + $0x40] sm:$0xf]  ;;  %v493_v19 = vld [vmem:[#allocation2 + $0x44] sm:$0xf0] }
  0x11   :  { %v403_v17 = vor.u32 %v494_v14, %v400_v15  ;;  %v492_v20 = vld [vmem:[#allocation2 + $0x44] sm:$0xf]  ;;  %v392_v21 = vld [vmem:[#allocation2 + $0x48] sm:$0xf0]  ;;  %v391_v22 = vor.u32 %v493_v19, %v390_v18  ;;  %v507_v23 = vld [vmem:[#allocation4 + $0x38] sm:$0xff] }
  0x12   :  { %v515_v24 = vld [vmem:[#allocation4 + $0x78] sm:$0xff]  ;;  %v395_v25 = vor.u32 %v492_v20, %v392_v21  ;;  %v382_v26 = vld [vmem:[#allocation2 + $0x30] sm:$0xf]  ;;  %v490_v28 = vld [vmem:[#allocation2 + $0x34] sm:$0xf]  ;;  %317 = vmatpush.bf16.msra.mxu2 %v507_v23 }
  0x13   :  { %160 = vmatpush.bf16.msra.mxu0 %v407_v10  ;;  %v491_v27 = vld [vmem:[#allocation2 + $0x34] sm:$0xf0]  ;;  %v384_v29 = vld [vmem:[#allocation2 + $0x38] sm:$0xf0]  ;;  %330 = vmatpush.bf16.msra.mxu3 %v515_v24  ;;  %v506_v30 = vld [vmem:[#allocation4 + $0x30] sm:$0xff] }
  0x14   :  { %173 = vmatpush.bf16.msra.mxu1 %v411_v11  ;;  %v514_v31 = vld [vmem:[#allocation4 + $0x70] sm:$0xff]  ;;  %v383_v32 = vor.u32 %v491_v27, %v382_v26  ;;  %v387_v33 = vor.u32 %v490_v28, %v384_v29  ;;  %v374_v34 = vld [vmem:[#allocation2 + $0x20] sm:$0xf]  ;;  %v489_v35 = vld [vmem:[#allocation2 + $0x24] sm:$0xf0] }
  0x15   :  { %v488_v36 = vld [vmem:[#allocation2 + $0x24] sm:$0xf]  ;;  %v376_v37 = vld [vmem:[#allocation2 + $0x28] sm:$0xf0]  ;;  %v375_v40 = vor.u32 %v489_v35, %v374_v34  ;;  %v366_v42 = vld [vmem:[#allocation2 + $0x10] sm:$0xf] }
  0x16   :  { %318 = vmatpush.bf16.msra.mxu2 %v506_v30  ;;  %v505_v38 = vld [vmem:[#allocation4 + $0x28] sm:$0xff]  ;;  %v379_v41 = vor.u32 %v488_v36, %v376_v37  ;;  %v487_v43 = vld [vmem:[#allocation2 + $0x14] sm:$0xf0]  ;;  %v486_v44 = vld [vmem:[#allocation2 + $0x14] sm:$0xf] }
  0x17   :  { %161 = vmatpush.bf16.msra.mxu0 %v399_v16  ;;  %331 = vmatpush.bf16.msra.mxu3 %v514_v31  ;;  %v513_v39 = vld [vmem:[#allocation4 + $0x68] sm:$0xff]  ;;  %v368_v45 = vld [vmem:[#allocation2 + $0x18] sm:$0xf0]  ;;  %v504_v46 = vld [vmem:[#allocation4 + $0x20] sm:$0xff]  ;;  %v367_v48 = vor.u32 %v487_v43, %v366_v42 }
  0x18   :  { %174 = vmatpush.bf16.msra.mxu1 %v403_v17  ;;  %v512_v47 = vld [vmem:[#allocation4 + $0x60] sm:$0xff]  ;;  %v371_v50 = vor.u32 %v486_v44, %v368_v45  ;;  %v485_v52 = vld [vmem:[#allocation2 + $0x4] sm:$0xf0]  ;;  %v360_v54 = vld [vmem:[#allocation2 + $0x8] sm:$0xf0] }
  0x19   :  { %v52_v49 = vld [vmem:[%s629_s0] sm:$0xff]  ;;  %v503_v55 = vld [vmem:[#allocation4 + $0x18] sm:$0xff]  ;;  %v502_v60 = vld [vmem:[#allocation4 + $0x10] sm:$0xff] }
  0x1a   :  { %319 = vmatpush.bf16.msra.mxu2 %v505_v38  ;;  %v358_v51 = vld [vmem:[#allocation2] sm:$0xf]  ;;  %v484_v53 = vld [vmem:[#allocation2 + $0x4] sm:$0xf]  ;;  %v511_v56 = vld [vmem:[#allocation4 + $0x58] sm:$0xff]  ;;  %v55_v57 = vmax.f32 %v52_v49, 0.0 }
  0x1b   :  { %162 = vmatpush.bf16.msra.mxu0 %v391_v22  ;;  %332 = vmatpush.bf16.msra.mxu3 %v513_v39  ;;  %v359_v58 = vor.u32 %v485_v52, %v358_v51  ;;  %v363_v59 = vor.u32 %v484_v53, %v360_v54  ;;  %v510_v61 = vld [vmem:[#allocation4 + $0x50] sm:$0xff]  ;;  %v501_v63 = vld [vmem:[#allocation4 + $0x8] sm:$0xff]  ;;  %v500_v1 = vld [vmem:[#allocation4] sm:$0xff] }
  0x1c   :  { %175 = vmatpush.bf16.msra.mxu1 %v395_v25  ;;  %v56_v62 = vpack.c.bf16 %v55_v57, %v55_v57  ;;  %v509_v0 = vld [vmem:[#allocation4 + $0x48] sm:$0xff]  ;;  %v508_v2 = vld [vmem:[#allocation4 + $0x40] sm:$0xff] }
  0x1d   :  { %v73_v3 = vld [vmem:[%s631_s2] sm:$0x3] }
  0x1e   :  { %320 = vmatpush.bf16.msra.mxu2 %v504_v46  ;;  %v75_v4 = vperm.slane %v73_v3, 0  ;;  %v76_v5 = vperm.slane %v73_v3, 1  ;;  %v522_v19 = vld [vmem:[%s633_s4] ss:$0 sm:$0xff] }
  0x1f   :  { %163 = vmatpush.bf16.msra.mxu0 %v383_v32  ;;  %333 = vmatpush.bf16.msra.mxu3 %v512_v47 }
  0x20   :  { %176 = vmatpush.bf16.msra.mxu1 %v387_v33 }
  0x22   :  { %321 = vmatpush.bf16.msra.mxu2 %v503_v55 }
  0x23   :  { %164 = vmatpush.bf16.msra.mxu0 %v375_v40  ;;  %334 = vmatpush.bf16.msra.mxu3 %v511_v56 }
  0x24   :  { %177 = vmatpush.bf16.msra.mxu1 %v379_v41 }
  0x26   :  { %322 = vmatpush.bf16.msra.mxu2 %v502_v60 }
  0x27   :  { %165 = vmatpush.bf16.msra.mxu0 %v367_v48  ;;  %335 = vmatpush.bf16.msra.mxu3 %v510_v61 }
  0x28   :  { %178 = vmatpush.bf16.msra.mxu1 %v371_v50 }
  0x2a   :  { %323 = vmatpush.bf16.msra.mxu2 %v501_v63 }
  0x2b   :  { %166 = vmatpush.bf16.msra.mxu0 %v359_v58  ;;  %336 = vmatpush.bf16.msra.mxu3 %v509_v0 }
  0x2c   :  { %179 = vmatpush.bf16.msra.mxu1 %v363_v59 }
  0x2e   :  { %167 = vmatmul.bf16.vlgmr.msra.gmra.mxu0 %v56_v62  ;;  %324 = vmatpush.bf16.msra.mxu2 %v500_v1 }
  0x2f   :  { %180 = vmatmul.bf16.vlgmr.msra.gmra.mxu1 %v56_v62  ;;  %337 = vmatpush.bf16.msra.mxu3 %v508_v2 }
  0xab   :  { %v168_v6 = vpop.f32.mrf.mxu0 }
  0xac   :  { %v169_v7 = vadd.f32 %v168_v6, %v75_v4  ;;  %v181_v8 = vpop.f32.mrf.mxu1 }
  0xad   :  { %v182_v9 = vadd.f32 %v181_v8, %v76_v5 }
  0xae   :  { %v185_v10 = vmax.f32 %v169_v7, 0.0 }
  0xaf   :  { %v186_v11 = vmax.f32 %v182_v9, 0.0 }
  0xb0   :  { %v187_v12 = vpack.c.bf16 %v185_v10, %v185_v10 }
  0xb1   :  { %v188_v13 = vpack.c.bf16 %v186_v11, %v186_v11 }
  0xb2   :  { %325 = vmatmul.bf16.vlgmr.msra.gmra.mxu2 %v187_v12 }
  0xb3   :  { %338 = vmatmul.bf16.vlgmr.msra.gmra.mxu3 %v188_v13  ;;  %v170_v14 = vpop.f32.mrf.mxu0 }
  0xb4   :  { %v183_v15 = vpop.f32.mrf.mxu1 }
 0x135   :  { %v326_v16 = vpop.f32.mrf.mxu2 }
 0x136   :  { %v339_v17 = vpop.f32.mrf.mxu3 }
 0x137   :  { %v340_v18 = vadd.f32 %v339_v17, %v326_v16 }
 0x139   :  { %v343_v20 = vadd.f32 %v340_v18, %v52_v49 }
 0x13b   :  { %v348_v21 = vadd.f32 %v522_v19, %v343_v20 }
 0x13d   :  { %349 = vst [vmem:[%s634_s5] sm:$0xff] %v348_v21  ;;  %v328_v22 = vpop.f32.mrf.mxu2 }
 0x13e   :  { %v341_v23 = vpop.f32.mrf.mxu3 }
 0x13f   :  { %354 = vsyncpa [#allocation3], 1 }
 0x140   :  { %355 = vsyncpa [#allocation5], 1 }

</bundles_post_ra>
